<compile_context>
chip_gen: v7x
topology: tpu7x:2x2x1
jax: 0.10.0
libtpu: 0.0.40
codegen_flags: <defaults>
</compile_context>

<pallas_src>
import numpy as np
import jax
import jax.numpy as jnp
from jax.experimental import pallas as pl
from jax.experimental.pallas import tpu as pltpu

# pywt is not available in-script; these are pywt.Wavelet('haar').rec_lo/rec_hi.
# TODO(synk): pywt.Wavelet coefficient lookup has no in-script equivalent; for
# other wavelets pass their rec_lo / rec_hi coefficient arrays to idwt_2d().
_S = 1.0 / np.sqrt(2.0)
HAAR_REC_LO = np.array([_S, _S], dtype=np.float64)
HAAR_REC_HI = np.array([_S, -_S], dtype=np.float64)


def _upsample_matrix_1d(n_in, filt):
    """(n_in, 2*(n_in-1)+L) matrix of a 1-D stride-2 transposed convolution."""
    L = filt.shape[0]
    n_out = 2 * (n_in - 1) + L
    m = np.zeros((n_in, n_out), dtype=np.float64)
    for i in range(n_in):
        m[i, 2 * i:2 * i + L] += filt
    return m


def _idwt_kernel(x_ref, rw_ref, rht_ref, o_ref):
    # x_ref:   (4, H, W)      the four subbands of one (n, c) pair
    # rw_ref:  (4, W, Wout)   per-subband width (column) reconstruction operator
    # rht_ref: (4, Hout, H)   per-subband height (row) operator, pre-transposed
    # o_ref:   (Hout, Wout)
    acc = jnp.zeros(o_ref.shape, jnp.float32)
    for s in range(4):                                   # static unroll, 4 subbands
        # width pass: (H, W) @ (W, Wout) -> (H, Wout)
        t = jnp.dot(x_ref[s], rw_ref[s], preferred_element_type=jnp.float32)
        # height pass + subband accumulation: (Hout, H) @ (H, Wout)
        acc = acc + jnp.dot(rht_ref[s], t, preferred_element_type=jnp.float32)
    o_ref[...] = acc.astype(o_ref.dtype)


def idwt_2d(x, rec_lo=HAAR_REC_LO, rec_hi=HAAR_REC_HI):
    """x: (N, 4*C, H, W), subband-major channel blocks [LL|LH|HL|HH] of C
    channels each (the layout the PyTorch IDWT_Function expects).
    Returns (N, C, 2*(H-1)+L, 2*(W-1)+L)."""
    N, C4, H, W = x.shape
    assert C4 % 4 == 0, "channel dim must be 4*C"
    C = C4 // 4
    lo = np.asarray(rec_lo, dtype=np.float64)
    hi = np.asarray(rec_hi, dtype=np.float64)
    L = lo.shape[0]
    Hout, Wout = 2 * (H - 1) + L, 2 * (W - 1) + L

    # Per-subband (height filter, width filter) pairs in the module's filter
    # order: w_ll = lo(row) lo(col), w_lh = hi(row) lo(col), w_hl = lo(row) hi(col),
    # w_hh = hi(row) hi(col).
    pairs = [(lo, lo), (hi, lo), (lo, hi), (hi, hi)]
    rw = jnp.asarray(np.stack([_upsample_matrix_1d(W, fw) for _, fw in pairs])
                     .astype(np.float32))                       # (4, W, Wout)
    rht = jnp.asarray(np.stack([_upsample_matrix_1d(H, fh).T for fh, _ in pairs])
                      .astype(np.float32))                      # (4, Hout, H)
    # NOTE: the separable taps are +-1/sqrt(2) (not bf16-exact); operators stay
    # f32 so the 1e-5 tolerance holds.  They are VMEM-resident anyway, so the
    # bf16 bandwidth argument from the dense-operator version no longer applies.

    # Free view reshape (no transpose, no materialized copy): 4*C channel dim
    # -> (subband, channel), matching x.view(B, 4, -1, H, W) in the module.
    x5 = x.reshape(N, 4, C, H, W)

    flops = 2 * N * C * 4 * (H * W * Wout + Hout * H * Wout)
    bytes_accessed = (x5.size * x5.dtype.itemsize
                      + rw.size * rw.dtype.itemsize
                      + rht.size * rht.dtype.itemsize
                      + N * C * Hout * Wout * x.dtype.itemsize)

    # One grid step per (n, c): X block and output block are streamed exactly
    # once; the two tiny operators have constant block indices so they are
    # DMAed a single time and stay resident in VMEM for the whole grid.
    # TODO(synk): for very small H with very large N*C, block several channels
    # per grid step (M = cb*H in the width pass) to raise per-step MXU work.
    out = pl.pallas_call(
        _idwt_kernel,
        out_shape=jax.ShapeDtypeStruct((N, C, Hout, Wout), x.dtype),
        grid_spec=pltpu.PrefetchScalarGridSpec(
            num_scalar_prefetch=0,
            grid=(N, C),
            in_specs=[
                pl.BlockSpec((None, 4, None, H, W),
                             lambda n, c: (n, 0, c, 0, 0)),      # activations
                pl.BlockSpec((4, W, Wout), lambda n, c: (0, 0, 0)),   # width op
                pl.BlockSpec((4, Hout, H), lambda n, c: (0, 0, 0)),   # height op^T
            ],
            out_specs=pl.BlockSpec((None, None, Hout, Wout),
                                   lambda n, c: (n, c, 0, 0)),
        ),
        compiler_params=pltpu.CompilerParams(
            dimension_semantics=("parallel", "parallel")),
        cost_estimate=pl.CostEstimate(flops=flops, transcendentals=0,
                                      bytes_accessed=bytes_accessed),
    )(x5, rw, rht)
    return out


def _reference(x, rec_lo, rec_hi):
    """Independent pure-JAX reference: direct stride-2 scatter form of the
    grouped conv_transpose2d (PyTorch semantics, kernel used un-flipped)."""
    N, C4, H, W = x.shape
    C = C4 // 4
    lo = np.asarray(rec_lo, np.float64)
    hi = np.asarray(rec_hi, np.float64)
    ws = np.stack([np.outer(lo, lo), np.outer(hi, lo),
                   np.outer(lo, hi), np.outer(hi, hi)], axis=0)   # (4, L, L)
    L = lo.shape[0]
    Hout, Wout = 2 * (H - 1) + L, 2 * (W - 1) + L
    x5 = x.reshape(N, 4, C, H, W).astype(jnp.float32)
    out = jnp.zeros((N, C, Hout, Wout), jnp.float32)
    for p in range(L):
        for q in range(L):
            contrib = jnp.einsum('nscij,s->ncij', x5,
                                 jnp.asarray(ws[:, p, q], jnp.float32))
            out = out.at[:, :, p:p + 2 * H:2, q:q + 2 * W:2].add(contrib)
    return out


if __name__ == "__main__":
    key = jax.random.PRNGKey(0)
    N, C, H, W = 2, 4, 16, 16            # input channels = 4*C = 16 (subband-major)
    x = jax.random.normal(key, (N, 4 * C, H, W), dtype=jnp.float32)

    out = idwt_2d(x)
    out = jax.block_until_ready(out)

    ref = _reference(x, HAAR_REC_LO, HAAR_REC_HI)
    assert out.shape == (N, C, 2 * H, 2 * W), out.shape
    np.testing.assert_allclose(np.asarray(out), np.asarray(ref),
                               rtol=1e-5, atol=1e-5)

    print("KERNEL_OK")
</pallas_src>

<mosaic_0001>
module attributes {stable_mosaic.version = 11 : i64} {
  func.func @_idwt_kernel(%arg0: i32, %arg1: i32, %arg2: memref<1x4x1x16x16xf32, #tpu.memory_space<vmem>>, %arg3: memref<4x16x32xf32, #tpu.memory_space<vmem>>, %arg4: memref<4x32x16xf32, #tpu.memory_space<vmem>>, %arg5: memref<1x1x32x32xf32, #tpu.memory_space<vmem>>) attributes {dimension_semantics = [#tpu.dimension_semantics<parallel>, #tpu.dimension_semantics<parallel>], iteration_bounds = array<i64: 2, 4>, scalar_prefetch = 0 : i64, scratch_operands = 0 : i64, tpu.core_type = #tpu.core_type<tc>, window_params = [{transform_indices = @transform_0, window_bounds = array<i64: 1, 4, 1, 16, 16>}, {pipeline_mode = #tpu.pipeline_mode<synchronous>, transform_indices = @transform_1, window_bounds = array<i64: 4, 16, 32>}, {pipeline_mode = #tpu.pipeline_mode<synchronous>, transform_indices = @transform_2, window_bounds = array<i64: 4, 32, 16>}, {transform_indices = @transform_3, window_bounds = array<i64: 1, 1, 32, 32>}]} {
    %cst = arith.constant 0.000000e+00 : f32
    %0 = vector.broadcast %cst : f32 to vector<32x32xf32>
    %c0 = arith.constant 0 : index
    %c0_0 = arith.constant 0 : index
    %c0_1 = arith.constant 0 : index
    %c0_2 = arith.constant 0 : index
    %c0_3 = arith.constant 0 : index
    %1 = vector.load %arg2[%c0, %c0_0, %c0_1, %c0_2, %c0_3] : memref<1x4x1x16x16xf32, #tpu.memory_space<vmem>>, vector<1x1x1x16x16xf32>
    %2 = vector.shape_cast %1 : vector<1x1x1x16x16xf32> to vector<16x16xf32>
    %c0_4 = arith.constant 0 : index
    %c0_5 = arith.constant 0 : index
    %c0_6 = arith.constant 0 : index
    %3 = vector.load %arg3[%c0_4, %c0_5, %c0_6] : memref<4x16x32xf32, #tpu.memory_space<vmem>>, vector<1x16x32xf32>
    %4 = vector.shape_cast %3 : vector<1x16x32xf32> to vector<16x32xf32>
    %cst_7 = arith.constant dense<0.000000e+00> : vector<16x32xf32>
    %5 = tpu.matmul %2, %4, %cst_7 {dimension_numbers = #tpu.dot_dimension_numbers<[1], [0], [0], [1], [0, 0, 1, 1], [], []>} : vector<16x16xf32>, vector<16x32xf32>, vector<16x32xf32> -> vector<16x32xf32>
    %c0_8 = arith.constant 0 : index
    %c0_9 = arith.constant 0 : index
    %c0_10 = arith.constant 0 : index
    %6 = vector.load %arg4[%c0_8, %c0_9, %c0_10] : memref<4x32x16xf32, #tpu.memory_space<vmem>>, vector<1x32x16xf32>
    %7 = vector.shape_cast %6 : vector<1x32x16xf32> to vector<32x16xf32>
    %cst_11 = arith.constant dense<0.000000e+00> : vector<32x32xf32>
    %8 = tpu.matmul %7, %5, %cst_11 {dimension_numbers = #tpu.dot_dimension_numbers<[1], [0], [0], [1], [0, 0, 1, 1], [], []>} : vector<32x16xf32>, vector<16x32xf32>, vector<32x32xf32> -> vector<32x32xf32>
    %9 = arith.addf %0, %8 : vector<32x32xf32>
    %c0_12 = arith.constant 0 : index
    %c1 = arith.constant 1 : index
    %c0_13 = arith.constant 0 : index
    %c0_14 = arith.constant 0 : index
    %c0_15 = arith.constant 0 : index
    %10 = vector.load %arg2[%c0_12, %c1, %c0_13, %c0_14, %c0_15] : memref<1x4x1x16x16xf32, #tpu.memory_space<vmem>>, vector<1x1x1x16x16xf32>
    %11 = vector.shape_cast %10 : vector<1x1x1x16x16xf32> to vector<16x16xf32>
    %c1_16 = arith.constant 1 : index
    %c0_17 = arith.constant 0 : index
    %c0_18 = arith.constant 0 : index
    %12 = vector.load %arg3[%c1_16, %c0_17, %c0_18] : memref<4x16x32xf32, #tpu.memory_space<vmem>>, vector<1x16x32xf32>
    %13 = vector.shape_cast %12 : vector<1x16x32xf32> to vector<16x32xf32>
    %cst_19 = arith.constant dense<0.000000e+00> : vector<16x32xf32>
    %14 = tpu.matmul %11, %13, %cst_19 {dimension_numbers = #tpu.dot_dimension_numbers<[1], [0], [0], [1], [0, 0, 1, 1], [], []>} : vector<16x16xf32>, vector<16x32xf32>, vector<16x32xf32> -> vector<16x32xf32>
    %c1_20 = arith.constant 1 : index
    %c0_21 = arith.constant 0 : index
    %c0_22 = arith.constant 0 : index
    %15 = vector.load %arg4[%c1_20, %c0_21, %c0_22] : memref<4x32x16xf32, #tpu.memory_space<vmem>>, vector<1x32x16xf32>
    %16 = vector.shape_cast %15 : vector<1x32x16xf32> to vector<32x16xf32>
    %cst_23 = arith.constant dense<0.000000e+00> : vector<32x32xf32>
    %17 = tpu.matmul %16, %14, %cst_23 {dimension_numbers = #tpu.dot_dimension_numbers<[1], [0], [0], [1], [0, 0, 1, 1], [], []>} : vector<32x16xf32>, vector<16x32xf32>, vector<32x32xf32> -> vector<32x32xf32>
    %18 = arith.addf %9, %17 : vector<32x32xf32>
    %c0_24 = arith.constant 0 : index
    %c2 = arith.constant 2 : index
    %c0_25 = arith.constant 0 : index
    %c0_26 = arith.constant 0 : index
    %c0_27 = arith.constant 0 : index
    %19 = vector.load %arg2[%c0_24, %c2, %c0_25, %c0_26, %c0_27] : memref<1x4x1x16x16xf32, #tpu.memory_space<vmem>>, vector<1x1x1x16x16xf32>
    %20 = vector.shape_cast %19 : vector<1x1x1x16x16xf32> to vector<16x16xf32>
    %c2_28 = arith.constant 2 : index
    %c0_29 = arith.constant 0 : index
    %c0_30 = arith.constant 0 : index
    %21 = vector.load %arg3[%c2_28, %c0_29, %c0_30] : memref<4x16x32xf32, #tpu.memory_space<vmem>>, vector<1x16x32xf32>
    %22 = vector.shape_cast %21 : vector<1x16x32xf32> to vector<16x32xf32>
    %cst_31 = arith.constant dense<0.000000e+00> : vector<16x32xf32>
    %23 = tpu.matmul %20, %22, %cst_31 {dimension_numbers = #tpu.dot_dimension_numbers<[1], [0], [0], [1], [0, 0, 1, 1], [], []>} : vector<16x16xf32>, vector<16x32xf32>, vector<16x32xf32> -> vector<16x32xf32>
    %c2_32 = arith.constant 2 : index
    %c0_33 = arith.constant 0 : index
    %c0_34 = arith.constant 0 : index
    %24 = vector.load %arg4[%c2_32, %c0_33, %c0_34] : memref<4x32x16xf32, #tpu.memory_space<vmem>>, vector<1x32x16xf32>
    %25 = vector.shape_cast %24 : vector<1x32x16xf32> to vector<32x16xf32>
    %cst_35 = arith.constant dense<0.000000e+00> : vector<32x32xf32>
    %26 = tpu.matmul %25, %23, %cst_35 {dimension_numbers = #tpu.dot_dimension_numbers<[1], [0], [0], [1], [0, 0, 1, 1], [], []>} : vector<32x16xf32>, vector<16x32xf32>, vector<32x32xf32> -> vector<32x32xf32>
    %27 = arith.addf %18, %26 : vector<32x32xf32>
    %c0_36 = arith.constant 0 : index
    %c3 = arith.constant 3 : index
    %c0_37 = arith.constant 0 : index
    %c0_38 = arith.constant 0 : index
    %c0_39 = arith.constant 0 : index
    %28 = vector.load %arg2[%c0_36, %c3, %c0_37, %c0_38, %c0_39] : memref<1x4x1x16x16xf32, #tpu.memory_space<vmem>>, vector<1x1x1x16x16xf32>
    %29 = vector.shape_cast %28 : vector<1x1x1x16x16xf32> to vector<16x16xf32>
    %c3_40 = arith.constant 3 : index
    %c0_41 = arith.constant 0 : index
    %c0_42 = arith.constant 0 : index
    %30 = vector.load %arg3[%c3_40, %c0_41, %c0_42] : memref<4x16x32xf32, #tpu.memory_space<vmem>>, vector<1x16x32xf32>
    %31 = vector.shape_cast %30 : vector<1x16x32xf32> to vector<16x32xf32>
    %cst_43 = arith.constant dense<0.000000e+00> : vector<16x32xf32>
    %32 = tpu.matmul %29, %31, %cst_43 {dimension_numbers = #tpu.dot_dimension_numbers<[1], [0], [0], [1], [0, 0, 1, 1], [], []>} : vector<16x16xf32>, vector<16x32xf32>, vector<16x32xf32> -> vector<16x32xf32>
    %c3_44 = arith.constant 3 : index
    %c0_45 = arith.constant 0 : index
    %c0_46 = arith.constant 0 : index
    %33 = vector.load %arg4[%c3_44, %c0_45, %c0_46] : memref<4x32x16xf32, #tpu.memory_space<vmem>>, vector<1x32x16xf32>
    %34 = vector.shape_cast %33 : vector<1x32x16xf32> to vector<32x16xf32>
    %cst_47 = arith.constant dense<0.000000e+00> : vector<32x32xf32>
    %35 = tpu.matmul %34, %32, %cst_47 {dimension_numbers = #tpu.dot_dimension_numbers<[1], [0], [0], [1], [0, 0, 1, 1], [], []>} : vector<32x16xf32>, vector<16x32xf32>, vector<32x32xf32> -> vector<32x32xf32>
    %36 = arith.addf %27, %35 : vector<32x32xf32>
    %c0_48 = arith.constant 0 : index
    %c0_49 = arith.constant 0 : index
    %c0_50 = arith.constant 0 : index
    %c0_51 = arith.constant 0 : index
    %37 = vector.load %arg5[%c0_48, %c0_49, %c0_50, %c0_51] : memref<1x1x32x32xf32, #tpu.memory_space<vmem>>, vector<1x1x32x32xf32>
    %38 = vector.shape_cast %37 : vector<1x1x32x32xf32> to vector<32x32xf32>
    %39 = vector.shape_cast %36 : vector<32x32xf32> to vector<1x1x32x32xf32>
    tpu.vector_store %arg5[%c0_48, %c0_49, %c0_50, %c0_51], %39 {strides = array<i32>} : memref<1x1x32x32xf32, #tpu.memory_space<vmem>>, vector<1x1x32x32xf32>,
    return
  }
  func.func @transform_0(%arg0: i32, %arg1: i32) -> (i32, i32, i32, i32, i32) {
    %c0_i32 = arith.constant 0 : i32
    %c0_i32_0 = arith.constant 0 : i32
    %c0_i32_1 = arith.constant 0 : i32
    %c0_i32_2 = arith.constant 0 : i32
    return %arg0, %c0_i32, %arg1, %c0_i32_0, %c0_i32_1 : i32, i32, i32, i32, i32
  }
  func.func @transform_1(%arg0: i32, %arg1: i32) -> (i32, i32, i32) {
    %c0_i32 = arith.constant 0 : i32
    %c0_i32_0 = arith.constant 0 : i32
    %c0_i32_1 = arith.constant 0 : i32
    %c0_i32_2 = arith.constant 0 : i32
    return %c0_i32, %c0_i32_0, %c0_i32_1 : i32, i32, i32
  }
  func.func @transform_2(%arg0: i32, %arg1: i32) -> (i32, i32, i32) {
    %c0_i32 = arith.constant 0 : i32
    %c0_i32_0 = arith.constant 0 : i32
    %c0_i32_1 = arith.constant 0 : i32
    %c0_i32_2 = arith.constant 0 : i32
    return %c0_i32, %c0_i32_0, %c0_i32_1 : i32, i32, i32
  }
  func.func @transform_3(%arg0: i32, %arg1: i32) -> (i32, i32, i32, i32) {
    %c0_i32 = arith.constant 0 : i32
    %c0_i32_0 = arith.constant 0 : i32
    %c0_i32_1 = arith.constant 0 : i32
    return %arg0, %arg1, %c0_i32, %c0_i32_0 : i32, i32, i32, i32
  }
}

</mosaic_0001>

<bundles_post_ra>
// kernel: tpu_custom_call.1
= control target key start
LH: loop header
LB: loop body
LE: loop exit
PB: predicated region body
PF: predicated region fallthrough
CT: control target
= control target key end

     0   :  { %8 = vsyncpa [#allocation3], 0  ;;  %s1825_s0 = inlined_call_operand.hbm [shape: f32[2,4,4,16,16], index: 0, kind: input, shape index: {}]   ;;  %s1826_s1 = inlined_call_operand.vmem [shape: f32[4,16,32], index: 1, kind: input, shape index: {}]   ;;  %s1827_s2 = inlined_call_operand.vmem [shape: f32[4,32,16], index: 2, kind: input, shape index: {}]   ;;  %s1828_s3 = inlined_call_operand.hbm [shape: f32[2,4,32,32], index: 3, kind: output, shape index: {}]  }
   0x1   :  { %10 = vsyncpa [#allocation3 + $0x1], 0 }
   0x2   :  { %11 = vsyncpa [#allocation4], 0 }
   0x3   :  { %13 = vsyncpa [#allocation4 + $0x1], 0  ;;  %s1541_s12 = smov 0   ;;  %s1543_s13 = smov 0  }
   0x4   :  { %s1545_s14 = smov 0   ;;  %s1547_s15 = smov 0  }
   0x5   :  { %s1549_s16 = smov 0   ;;  %s1551_s17 = smov 0  }
   0x6   :  { %s1553_s18 = smov 0   ;;  %s1555_s19 = smov 0  }
   0x7 LB: > { %s1105_s20 = sadd.s32 4294967295, %s1510_s19   ;;  %s1106_s21 = sadd.s32 4294967294, %s1510_s19   ;;  %s1510_s19 = sphi %s1555_s19, %s19_s19   ;;  %s1506_s18 = sphi %s1553_s18, %s1845_s18   ;;  %s1502_s17 = sphi %s1551_s17, %s1844_s17   ;;  %s1498_s16 = sphi %s1549_s16, %s1843_s16   ;;  %s1494_s15 = sphi %s1547_s15, %s1842_s15   ;;  %s1490_s14 = sphi %s1545_s14, %s1841_s14   ;;  %s1486_s13 = sphi %s1543_s13, %s1840_s13   ;;  %s1482_s12 = sphi %s1541_s12, %s1839_s12  }
   0x8   : > { %s28_s22 = sadd.s32 1, %s1502_s17  ;;  %s31_s23 = sadd.s32 1, %s1506_s18 }
   0x9   : > { %p29_p0 = scmp.ge.s32.totalorder %s28_s22, 4  ;;  %p47_p1 = scmp.ne.s32.totalorder %s1490_s14, %s1486_s13 }
   0xa   : > { %p48_p2 = scmp.eq.s32.totalorder %s1510_s19, 0  ;;  %p53_p5 = scmp.ne.s32.totalorder %s1486_s13, %s1482_s12 }
   0xb   : > { %s1847_s22 = smov (%p29_p0, %s28_s22), 0  ;;  %s1849_s23 = smov (!%p29_p0, %s31_s23), %s1506_s18 }
   0xc   : > { %1831 = sst [smem:[#allocation11_spill]] %s1847_s22  ;;  %s36_s24 = ssub.s32 %s1502_s17, %s1847_s22 }
   0xd   : > { %p1593_p3 = por %p48_p2, %p47_p1  ;;  %p33_p4 = scmp.ge.s32.totalorder %s1849_s23, 2 }
   0xe   : > { %p54_p6 = scmp.eq.s32.totalorder %s1105_s20, 0  ;;  %p121_p7 = scmp.eq.s32.totalorder %s1105_s20, 7 }
   0xf   : > { %s1851_s23 = smov (%p33_p4, %s1849_s23), 0  ;;  %p127_p10 = scmp.eq.s32.totalorder %s1106_s21, 7 }
  0x10   : > { %1833 = sst [smem:[#allocation12_spill]] %s1851_s23  ;;  %p1601_p8 = por %p54_p6, %p53_p5 }
  0x11   : > { %p1605_p9 = por %p121_p7, %p47_p1  ;;  %s35_s28 = ssub.s32 %s1506_s18, %s1851_s23 }
  0x12   : > { %s37_s29 = sor.u32 %s36_s24, %s35_s28  ;;  %s40_s30 = sadd.s32 1, %s1490_s14 }
  0x13   : > { %p38_p11 = scmp.eq.s32.totalorder %s37_s29, 0  ;;  %p1612_p12 = por %p127_p10, %p53_p5 }
  0x14   : > { %p1108_p13 = scmp.ge.s32.totalorder %s1510_s19, 8 }
  0x15   : > { %s1617_s5 = scalar_select %p38_p11, %s1490_s14, %s40_s30  }
  0x16   : > { %149 = sbr.rel (%p1108_p13) target bundleno = 45 (0x2d), region = 24 }
  0x1d   : > { %s153_s6 = sand.u32 1, %s1490_s14   ;;  %s1110_s7 = sshll.u32 %s1502_s17, 1 }
  0x1e   : > { %s1109_s8 = sshll.u32 %s153_s6, 6  ;;  %s1111_s9 = sshll.u32 %s1506_s18, 5 }
  0x1f   : > { %s163_s10 = sadd.s32 %s1111_s9, %s1110_s7  ;;  %s157_s11 = scalar_lea.vmem [#allocation2], %s1109_s8 }
  0x20   : > { %s178_s20 = sshll.u32 %s157_s11, 4  ;;  %s1112_s21 = sshll.u32 %s163_s10, 7  ;;  %s179_s20 = int_to_ptr.vmem [resolvable:$true] %s178_s20 }
  0x21   : > { %s1324_s24 = scalar_select %p1593_p3, [#allocation0], [#allocation8] }
  0x22   : > { %s1512_s28 = smov 1024   ;;  %s1513_s30 = smov 256  }
  0x23   : > { %1325 = sst [smem:[#allocation7]] (%p1593_p3), %s1512_s28  ;;  %s1514_s23 = smov 2  }
  0x24   : > { %s170_s29 = sld [smem:[%s1324_s24]]   ;;  %s1515_s7 = smov 128  }
  0x25   : > { %1326 = sst [smem:[#allocation7 + $0x1]] (%p1593_p3), %s1513_s30  ;;  %s165_s10 = scalar_lea.hbm %s1825_s0, %s1112_s21 }
  0x26   : > { %1327 = sst [smem:[#allocation7 + $0x2]] (%p1593_p3), %s1514_s23  ;;  %s1516_s11 = smov 8  }
  0x27   : > { %1328 = sst [smem:[#allocation7 + $0x3]] (%p1593_p3), %s1515_s7  ;;  %s154_s22 = scalar_lea.sflag [#allocation3], %s153_s6 }
  0x28   : > { %1329 = sst [smem:[#allocation7 + $0x4]] (%p1593_p3), %s1515_s7  ;;  %s1517_s30 = smov [#allocation6]  }
  0x29   : > { %1330 = sst [smem:[#allocation7 + $0x5]] (%p1593_p3), %s1516_s11 }
  0x2a   : > { %s1113_s24 = sshll.u32 %s170_s29, 26 }
  0x2b   : > { %s1114_s28 = sadd.s32 134217728, %s1113_s24 }
  0x2c   : > { %1331 = dma.general (%p1593_p3), %s165_s10, 1024, %s179_s20, %s154_s22, %s1517_s30, [#allocation7], %s1114_s28, 0  }
  0x2d PF: > { %p1115_p0 = scmp.ge.s32.totalorder %s1510_s19, 1  ;;  %p199_p1 = scmp.lt.s32.totalorder %s1510_s19, 9 }
  0x2f   : > { %p200_p2 = pnand %p1115_p0, %p199_p1 }
  0x30   : > { %s1645_s23 = sand.u32 (!%p200_p2), 1, %s1486_s13  }
  0x31   : > { %203 = sbr.rel (%p200_p2) target bundleno = 756 (0x2f4), region = 32  ;;  %s1116_s21 = sshll.u32 (!%p200_p2), %s1645_s23, 6 }
  0x32   : > { %s206_s29 = scalar_lea.sflag (!%p200_p2), [#allocation3], %s1645_s23  ;;  %s1649_s7 = scalar_lea.vmem (!%p200_p2), [#allocation2], %s1116_s21 }
  0x38   : > { %1473 = dma.done.wait (%p1601_p8), %s206_s29, 1024  }
  0x39   : > { %1475 = vsyncadd (%p1601_p8), %s206_s29, 4294966272  ;;  %vm236_vm0 = vcmask 130048   ;;  %v234_v0 = vld [vmem:[%s1826_s1] sm:$0xff]  ;;  %v235_v1 = vld [vmem:[%s1826_s1 + $0x8] sm:$0xff]  ;;  %s1167_s8 = sshll.u32 %s1494_s15, 2  ;;  %s1168_s26 = sshll.u32 %s1498_s16, 4 }
  0x3a   : > { %v232_v2 = vld [vmem:[%s1649_s7] sm:$0xff]  ;;  %v1280_v3 = vpack.c.bf16 %v235_v1, %v234_v0  ;;  %v1122_v4 = vld [vmem:[%s1826_s1 + $0x10] sm:$0xff]  ;;  %v1123_v5 = vld [vmem:[%s1826_s1 + $0x18] sm:$0xff]  ;;  %s1117_s9 = sshll.u32 %s1645_s23, 5  ;;  %s1012_s10 = sadd.s32 %s1168_s26, %s1167_s8  ;;  %vm994_vm1 = vcmask 261120  }
  0x3b   : > { %1216 = vmatprep.mubr.msk.f32.mxu1 %vm236_vm0, %v232_v2  ;;  %v1284_v6 = vpack.c.bf16 %v1123_v5, %v1122_v4  ;;  %v233_v7 = vld [vmem:[%s1649_s7 + $0x8] sm:$0xff]  ;;  %v1120_v8 = vld [vmem:[%s1649_s7 + $0x10] sm:$0xff]  ;;  %v1121_v9 = vld [vmem:[%s1649_s7 + $0x18] sm:$0xff]  ;;  %s231_s11 = scalar_lea.vmem [#allocation5], %s1117_s9  ;;  %s1169_s28 = sshll.u32 %s1012_s10, 7 }
  0x3c   : > { %1281 = vmatprep.subr.bf16.mxu1 %v1280_v3  ;;  %v1126_v10 = vld [vmem:[%s1827_s2 + $0x20] sm:$0xff]  ;;  %v1141_v15 = vld [vmem:[%s1826_s1 + $0x28] sm:$0xff]  ;;  %v1154_v20 = vld [vmem:[%s1826_s1 + $0x30] sm:$0xff]  ;;  %s1015_s24 = sshll.u32 %s231_s11, 4  ;;  %s1769_s30 = scalar_lea.hbm %s1828_s3, %s1169_s28  ;;  %s1763_s24 = int_to_ptr.vmem [resolvable:$true] %s1015_s24 }
  0x3d   : > { %1283 = vmatpush3.bf16.msra.mxu1 %v1280_v3  ;;  %v1140_v14 = vld [vmem:[%s1826_s1 + $0x20] sm:$0xff]  ;;  %v1155_v21 = vld [vmem:[%s1826_s1 + $0x38] sm:$0xff]  ;;  %v1127_v22 = vld [vmem:[%s1827_s2 + $0x28] sm:$0xff]  ;;  %s1000_s21 = scalar_lea.sflag [#allocation4], %s1645_s23  ;;  %s1412_s29 = scalar_lea.vmem %s1763_s24, 512 }
  0x3e   : > { %1285 = vmatprep.subr.bf16.mxu1 %v1284_v6  ;;  %v1296_v19 = vpack.c.bf16 %v1141_v15, %v1140_v14  ;;  %v1128_v23 = vld [vmem:[%s1827_s2 + $0x30] sm:$0xff]  ;;  %v1304_v24 = vpack.c.bf16 %v1155_v21, %v1154_v20  ;;  %v1129_v25 = vld [vmem:[%s1827_s2 + $0x38] sm:$0xff]  ;;  %v1138_v26 = vld [vmem:[%s1649_s7 + $0x20] sm:$0xff]  ;;  %p1413_p3 = scmp.ne.s32.totalorder %s1763_s24, %s1412_s29  ;;  %s1518_s22 = smov [#allocation5]  }
  0x3f   : > { %v1139_v27 = vld [vmem:[%s1649_s7 + $0x28] sm:$0xff]  ;;  %v1152_v28 = vld [vmem:[%s1649_s7 + $0x30] sm:$0xff]  ;;  %v1153_v29 = vld [vmem:[%s1649_s7 + $0x38] sm:$0xff]  ;;  %s1416_s25 = sshll.u32 %s1518_s22, 4  ;;  %s1417_s25 = int_to_ptr.vmem [resolvable:$false] %s1416_s25 }
  0x40   : > { %1217 = vmatmul.mubr.msk.f32.vlgmr.msra.gmra.mrb[0].mxu1 %vm236_vm0, %v233_v7  ;;  %v318_v30 = vld [vmem:[%s1827_s2] sm:$0xff]  ;;  %v319_v31 = vld [vmem:[%s1827_s2 + $0x8] sm:$0xff]  ;;  %v320_v32 = vld [vmem:[%s1827_s2 + $0x10] sm:$0xff]  ;;  %p1414_p4 = pnand %p1413_p3, %p1605_p9  ;;  %s1418_s6 = scalar_lea.vmem %s1417_s25, 1024 }
  0x41   : > { %1287 = vmatpush3.bf16.msra.mxu1 %v1284_v6  ;;  %1223 = vmatprep.mubr.msk.f32.mxu1 %vm236_vm0, %v1120_v8  ;;  %v321_v33 = vld [vmem:[%s1827_s2 + $0x18] sm:$0xff]  ;;  %v1144_v34 = vld [vmem:[%s1827_s2 + $0x40] sm:$0xff]  ;;  %v1145_v44 = vld [vmem:[%s1827_s2 + $0x48] sm:$0xff]  ;;  %p1419_p6 = scmp.lt.s32.totalorder %s1763_s24, %s1417_s25  ;;  %p1420_p7 = scmp.lt.s32.totalorder %s1418_s6, %s1412_s29 }
  0x42   : > { %1240 = vmatprep.mubr.msk.f32.mxu0 %vm236_vm0, %v318_v30  ;;  %v1146_v46 = vld [vmem:[%s1827_s2 + $0x50] sm:$0xff]  ;;  %v1147_v47 = vld [vmem:[%s1827_s2 + $0x58] sm:$0xff]  ;;  %v1158_v48 = vld [vmem:[%s1827_s2 + $0x60] sm:$0xff]  ;;  %p1415_p5 = pneg %p1414_p4 }
  0x43   : > { %v1159_v49 = vld [vmem:[%s1827_s2 + $0x68] sm:$0xff]  ;;  %v1160_v50 = vld [vmem:[%s1827_s2 + $0x70] sm:$0xff]  ;;  %v1161_v51 = vld [vmem:[%s1827_s2 + $0x78] sm:$0xff]  ;;  %p1421_p8 = por %p1420_p7, %p1419_p6 }
  0x44   : > { %1224 = vmatmul.mubr.msk.f32.vlgmr.msra.gmra.mrb[2].mxu1 %vm236_vm0, %v1121_v9 }
  0x45   : > { %1230 = vmatprep.mubr.msk.f32.mxu1 %vm236_vm0, %v1126_v10  ;;  %p1422_p10 = pnand %p1421_p8, %p1415_p5 }
 0x113   : > { %v1218_v11 = vpop.f32.mrb[0].mxu1 }
 0x114   : > { %v309_v12 = vpop.f32.mrb[1].mxu1 }
 0x115   : > { %v1292_v13 = vpack.c.bf16 %v1218_v11, %v309_v12 }
 0x117   : > { %v1225_v16 = vpop.f32.mrb[2].mxu1  ;;  %1293 = vmatprep.subr.bf16.mxu0 %v1292_v13 }
 0x118   : > { %v400_v17 = vpop.f32.mrb[3].mxu1  ;;  %1295 = vmatpush3.bf16.msra.mxu0 %v1292_v13 }
 0x119   : > { %v1288_v18 = vpack.c.bf16 %v1225_v16, %v400_v17 }
 0x11b   : > { %1289 = vmatprep.subr.bf16.mxu1 %v1288_v18  ;;  %1241 = vmatmul.mubr.msk.f32.vlgmr.msra.gmra.mrb[0].mxu0 %vm236_vm0, %v319_v31 }
 0x11c   : > { %1291 = vmatpush3.bf16.msra.mxu1 %v1288_v18  ;;  %1243 = vmatprep.mubr.msk.f32.mxu0 %vm236_vm0, %v320_v32 }
 0x11d   : > { %1297 = vmatprep.subr.bf16.mxu1 %v1296_v19 }
 0x11f   : > { %1231 = vmatmul.mubr.msk.f32.vlgmr.msra.gmra.mrb[4].mxu1 %vm236_vm0, %v1127_v22  ;;  %1244 = vmatmul.mubr.msk.f32.gmra.mrb[2].mxu0 %vm236_vm0, %v321_v33 }
 0x120   : > { %1233 = vmatprep.mubr.msk.f32.mxu1 %vm236_vm0, %v1128_v23  ;;  %1299 = vmatpush3.bf16.msra.mxu1 %v1296_v19 }
 0x121   : > { %1305 = vmatprep.subr.bf16.mxu1 %v1304_v24  ;;  %1257 = vmatprep.mubr.msk.f32.mxu0 %vm236_vm0, %v1144_v34 }
 0x123   : > { %1234 = vmatmul.mubr.msk.f32.gmra.mrb[6].mxu1 %vm236_vm0, %v1129_v25 }
 0x124   : > { %1250 = vmatprep.mubr.msk.f32.mxu1 %vm236_vm0, %v1138_v26 }
 0x127   : > { %1251 = vmatmul.mubr.msk.f32.vlgmr.msra.gmra.mrb[8].mxu1 %vm236_vm0, %v1139_v27 }
 0x128   : > { %1307 = vmatpush3.bf16.msra.mxu1 %v1304_v24  ;;  %1267 = vmatprep.mubr.msk.f32.mxu1 %vm236_vm0, %v1152_v28 }
 0x12b   : > { %1268 = vmatmul.mubr.msk.f32.vlgmr.msra.gmra.mrb[10].mxu1 %vm236_vm0, %v1153_v29 }
 0x1f2   : > { %v1232_v35 = vpop.f32.mrb[4].mxu1 }
 0x1f3   : > { %v492_v36 = vpop.f32.mrb[5].mxu1 }
 0x1f6   : > { %v1235_v37 = vpop.f32.mrb[6].mxu1 }
 0x1f7   : > { %v502_v38 = vpop.f32.mrb[7].mxu1 }
 0x1fa   : > { %v1252_v39 = vpop.f32.mrb[8].mxu1 }
 0x1fb   : > { %v686_v40 = vpop.f32.mrb[9].mxu1 }
 0x1fc   : > { %v1300_v41 = vpack.c.bf16 %v1252_v39, %v686_v40 }
 0x1fe   : > { %1301 = vmatprep.subr.bf16.mxu0 %v1300_v41  ;;  %v1269_v42 = vpop.f32.mrb[10].mxu1 }
 0x1ff   : > { %1303 = vmatpush3.bf16.msra.mxu0 %v1300_v41  ;;  %v879_v43 = vpop.f32.mrb[11].mxu1 }
 0x200   : > { %v1308_v45 = vpack.c.bf16 %v1269_v42, %v879_v43 }
 0x202   : > { %1258 = vmatmul.mubr.msk.f32.vlgmr.msra.gmra.mrb[0].mxu0 %vm236_vm0, %v1145_v44  ;;  %1309 = vmatprep.subr.bf16.mxu0 %v1308_v45 }
 0x203   : > { %1260 = vmatprep.mubr.msk.f32.mxu0 %vm236_vm0, %v1146_v46  ;;  %1311 = vmatpush3.bf16.msra.mxu0 %v1308_v45 }
 0x206   : > { %1261 = vmatmul.mubr.msk.f32.gmra.mrb[2].mxu0 %vm236_vm0, %v1147_v47 }
 0x207   : > { %1274 = vmatprep.mubr.msk.f32.mxu0 %vm236_vm0, %v1158_v48 }
 0x20a   : > { %1275 = vmatmul.mubr.msk.f32.vlgmr.msra.gmra.mrb[0].mxu0 %vm236_vm0, %v1159_v49 }
 0x20b   : > { %1277 = vmatprep.mubr.msk.f32.mxu0 %vm236_vm0, %v1160_v50 }
 0x20e   : > { %1278 = vmatmul.mubr.msk.f32.gmra.mrb[2].mxu0 %vm236_vm0, %v1161_v51 }
 0x2dd   : > { %v1276_v52 = vpop.f32.mrb[0].mxu0 }
 0x2de   : > { %v1312_v53 = vadd.f32 %v1276_v52, %v1232_v35  ;;  %v971_v54 = vpop.f32.mrb[1].mxu0 }
 0x2df   : > { %v1313_v55 = vadd.f32 %v971_v54, %v492_v36 }
 0x2e0   : > { %996 = vst.msk [vmem:[%s231_s11 + $0x8] sm:$0xff] %vm994_vm1, %v1312_v53 }
 0x2e1   : > { %995 = vst.msk [vmem:[%s231_s11] sm:$0xff] %vm994_vm1, %v1313_v55  ;;  %v1279_v56 = vpop.f32.mrb[2].mxu0 }
 0x2e2   : > { %v1314_v57 = vadd.f32 %v1279_v56, %v1235_v37  ;;  %v981_v58 = vpop.f32.mrb[3].mxu0 }
 0x2e3   : > { %v1315_v59 = vadd.f32 %v981_v58, %v502_v38 }
 0x2e4   : > { %998 = vst.msk [vmem:[%s231_s11 + $0x18] sm:$0xff] %vm994_vm1, %v1314_v57 }
 0x2e5   : > { %997 = vst.msk [vmem:[%s231_s11 + $0x10] sm:$0xff] %vm994_vm1, %v1315_v59 }
 0x2e6   : > { %1425 = shalt.err (!%p1422_p10)
}
 0x2e7   : > { %s1426_s7 = scalar_lea.hbm %s1769_s30, 512  ;;  %s1430_s26 = scalar_lea.hbm %s1828_s3, 4096 }
 0x2e8   : > { %p1427_p11 = scmp.ne.s32.totalorder %s1769_s30, %s1426_s7  ;;  %p1431_p1 = scmp.lt.u32.totalorder %s1769_s30, %s1828_s3 }
 0x2e9   : > { %p1432_p2 = scmp.lt.u32.totalorder %s1430_s26, %s1426_s7  ;;  %p1434_p4 = scmp.lt.u32.totalorder %s1426_s7, %s1769_s30 }
 0x2ea   : > { %p1428_p13 = pnand %p1427_p11, %p1605_p9 }
 0x2eb   : > { %p1433_p3 = por %p1432_p2, %p1431_p1 }
 0x2ec   : > { %p1429_p0 = pneg %p1428_p13 }
 0x2ed   : > { %p1435_p5 = por %p1434_p4, %p1433_p3 }
 0x2ef   : > { %p1436_p6 = pnand %p1435_p5, %p1429_p0 }
 0x2f1   : > { %1439 = shalt.err (!%p1436_p6)
}
 0x2f2   : > { %s1519_s11 = smov 128   ;;  %s1520_s28 = smov 8  }
 0x2f3   : > { %1333 = dma.vmem_to_hbm [thread:$0]  (%p1605_p9), %s1763_s24, 512, %s1769_s30, %s1000_s21, %s1519_s11, %s1519_s11, %s1520_s28  }
 0x2f4 PF: > { %p1339_p7 = scmp.ge.s32.totalorder %s1510_s19, 2  ;;  %s1030_s15 = sand.u32 1, %s1482_s12  }
 0x2f5   : > { %s1031_s16 = scalar_lea.sflag [#allocation4], %s1030_s15 }
 0x2f6   : > { %p1336_p8 = pnand %p1339_p7, %p1612_p12 }
 0x2f8   : > { %1477 = dma.done.wait (!%p1336_p8), %s1031_s16, 512  }
 0x2f9   : > { %1479 = vsyncadd (!%p1336_p8), %s1031_s16, 4294966784  ;;  %s19_s19 = sadd.s32 1, %s1510_s19   ;;  %s1837_s27 = sld [smem:[#allocation11_spill]] }
 0x2fa   : > { %p16_p10 = scmp.ge.s32.totalorder %s19_s19, 10   ;;  %s1838_s23 = sld [smem:[#allocation12_spill]] }
 0x2fb   : > { %s1839_s12 = smov %s1486_s13  ;;  %s1840_s13 = smov %s1490_s14 }
 0x2fc   : > { %s1841_s14 = smov %s1617_s5  ;;  %s1842_s15 = smov %s1502_s17 }
 0x2fd   : > { %s1843_s16 = smov %s1506_s18  ;;  %18 = sbr.rel (!%p16_p10) target bundleno = 7 (0x7), region = 91 }
 0x2ff   : > { %s1844_s17 = smov %s1837_s27 }
 0x300   : > { %s1845_s18 = smov %s1838_s23 }
 0x304   :  { %1036 = vsyncpa [#allocation3], 1 }
 0x305   :  { %1038 = vsyncpa [#allocation3 + $0x1], 1 }
 0x306   :  { %1039 = vsyncpa [#allocation4], 1 }
 0x307   :  { %1041 = vsyncpa [#allocation4 + $0x1], 1 }

</bundles_post_ra>
